<compile_context>
chip_gen: v7x
topology: tpu7x:2x2x1
jax: 0.10.0
libtpu: 0.0.40
codegen_flags: <defaults>
</compile_context>

<pallas_src>
import math

import jax
import jax.numpy as jnp
from jax.experimental import pallas as pl
from jax.experimental.pallas import tpu as pltpu

_LANE = 128


def _mlp_kernel(x_ref, *refs):
    """Fused MLP: all layers executed on one M-tile of the input.

    refs = (w0, b0, w1, b1, ..., w_{L-1}, b_{L-1}, out_ref)
    Each w_i is (in_i, out_i) in VMEM (compute dtype, e.g. bf16),
    each b_i is (1, out_i) in f32. The final layer's out dim is padded to a
    multiple of 128 so the output store is lane-dense / unmasked.
    """
    out_ref = refs[-1]
    params = refs[:-1]
    num_layers = len(params) // 2

    h = x_ref[...]
    for i in range(num_layers):
        w = params[2 * i][...]
        b = params[2 * i + 1][...]
        # f32 accumulation on the MXU regardless of operand dtype; f32 bias
        # added after accumulation.
        y = jnp.dot(h, w, preferred_element_type=jnp.float32) + b
        if i < num_layers - 1:
            # ReLU, then back to the compute dtype so the next dot stays a
            # bf16 x bf16 MXU pass.
            h = jnp.maximum(y, 0.0).astype(x_ref.dtype)
        else:
            h = y
    out_ref[...] = h.astype(out_ref.dtype)


def prepare_mlp_params(weights, biases, *, compute_dtype=jnp.bfloat16):
    """One-time parameter prep (call at model init, NOT per forward).

    weights : list of (out_i, in_i) arrays (PyTorch nn.Linear layout)
    biases  : list of (out_i,) arrays
    compute_dtype : MXU operand dtype for x/weights (bf16 recommended;
                    accumulation stays f32 inside the kernel).

    Returns (w_t, b_2d, out_dim):
      w_t  : tuple of (in_i, out_i) compute_dtype arrays; final layer
             zero-padded to a multiple of 128 output lanes
      b_2d : tuple of (1, out_i) f32 arrays; final layer zero-padded likewise
      out_dim : true (unpadded) output width
    """
    num_layers = len(weights)
    out_dim = int(weights[-1].shape[0])
    w_t, b_2d = [], []
    for i, (w, b) in enumerate(zip(weights, biases)):
        w = jnp.asarray(w, jnp.float32).T            # (in, out)
        b = jnp.asarray(b, jnp.float32).reshape(1, -1)
        if i == num_layers - 1:
            out_pad = max(_LANE, pl.cdiv(out_dim, _LANE) * _LANE)
            if out_pad != out_dim:
                w = jnp.pad(w, ((0, 0), (0, out_pad - out_dim)))
                b = jnp.pad(b, ((0, 0), (0, out_pad - out_dim)))
        w_t.append(w.astype(compute_dtype))
        b_2d.append(b)                               # bias stays f32
    return tuple(w_t), tuple(b_2d), out_dim


def _num_tensorcores():
    """TensorCores a 'parallel' grid axis is sharded across (best effort)."""
    try:
        kind = jax.devices()[0].device_kind.lower()
    except Exception:  # pragma: no cover - conservative fallback
        return 1
    if "v5" in kind or "v6" in kind:
        return 1          # v5e / v6e: single TensorCore per chip
    if "7" in kind:
        return 2          # v7x: two TensorCores per chip
    return 1


def _choose_tile_m(m, tile_m_max, num_cores):
    """Pick the M tile: one step on single-TC chips, balanced steps on multi-TC."""
    tile_m_max = max(8, (tile_m_max // 8) * 8)
    target = m if num_cores <= 1 else pl.cdiv(m, num_cores)
    tile = max(8, pl.cdiv(target, 8) * 8)
    return min(tile, tile_m_max)


def mlp_pallas(x, w_t, b_2d, out_dim, *, tile_m_max=1024, out_dtype=jnp.float32):
    """Run the fused MLP kernel on pre-prepared params.

    x        : (..., input_dim) array; all leading dims are flattened into M
               (stack multiple head invocations along a leading dim to share
               one pallas_call).
    w_t/b_2d : from prepare_mlp_params
    out_dim  : true output width (pre-padding)
    """
    *lead, input_dim = x.shape
    out_pad = int(w_t[-1].shape[1])
    compute_dtype = w_t[0].dtype

    m = math.prod(lead) if lead else 1
    x2d = x.reshape(m, input_dim).astype(compute_dtype)

    num_cores = _num_tensorcores()
    tile_m = _choose_tile_m(m, tile_m_max, num_cores)
    m_pad = pl.cdiv(m, tile_m) * tile_m
    if m_pad != m:
        x2d = jnp.pad(x2d, ((0, m_pad - m), (0, 0)))

    grid = (m_pad // tile_m,)

    in_specs = [pl.BlockSpec((tile_m, input_dim), lambda i: (i, 0))]
    args = [x2d]
    for w, b in zip(w_t, b_2d):
        # Whole-array (grid-invariant) blocks: weights stay resident in VMEM.
        # NOTE: at transformer-FFN widths, single-buffer these (Buffered(1))
        # and re-budget VMEM (v7x: 64 MiB physical / 32 MiB scoped default).
        in_specs.append(pl.BlockSpec(w.shape, lambda i: (0, 0)))
        in_specs.append(pl.BlockSpec(b.shape, lambda i: (0, 0)))
        args.extend([w, b])

    # Advisory cost for XLA's scheduler around this tiny custom call.
    flops = 2 * m_pad * sum(int(w.shape[0]) * int(w.shape[1]) for w in w_t)
    bytes_accessed = int(
        x2d.size * x2d.dtype.itemsize
        + sum(w.size * w.dtype.itemsize for w in w_t)
        + sum(b.size * b.dtype.itemsize for b in b_2d)
        + m_pad * out_pad * jnp.dtype(out_dtype).itemsize)
    cost = pl.CostEstimate(flops=flops, transcendentals=0,
                           bytes_accessed=bytes_accessed)

    out = pl.pallas_call(
        _mlp_kernel,
        out_shape=jax.ShapeDtypeStruct((m_pad, out_pad), out_dtype),
        grid_spec=pl.GridSpec(
            grid=grid,
            in_specs=in_specs,
            out_specs=pl.BlockSpec((tile_m, out_pad), lambda i: (i, 0)),
        ),
        compiler_params=pltpu.CompilerParams(
            dimension_semantics=("parallel",)),
        cost_estimate=cost,
    )(*args)

    out = out[:m, :out_dim]
    return out.reshape(*lead, out_dim)


def _init_linear_params(key, in_dim, out_dim):
    """Deterministic init mimicking nn.Linear default (kaiming-uniform-ish)."""
    kw, kb = jax.random.split(key)
    bound = 1.0 / jnp.sqrt(jnp.float32(in_dim))
    w = jax.random.uniform(kw, (out_dim, in_dim), jnp.float32, -bound, bound)
    b = jax.random.uniform(kb, (out_dim,), jnp.float32, -bound, bound)
    return w, b


def _mlp_reference(x, weights, biases):
    """Pure-JAX f32 reference reproducing the PyTorch forward exactly."""
    num_layers = len(weights)
    h = x
    for i, (w, b) in enumerate(zip(weights, biases)):
        h = h @ w.T + b
        if i < num_layers - 1:
            h = jnp.maximum(h, 0.0)
    return h


if __name__ == "__main__":
    # MLP(input_dim=32, hidden_dim=32, output_dim=4, num_layers=3, act='relu')
    # — same shape pattern as the RT-DETR bbox head, at small sizes.
    input_dim, hidden_dim, output_dim, num_layers = 32, 32, 4, 3

    key = jax.random.PRNGKey(0)
    keys = jax.random.split(key, num_layers + 2)

    dims_in = [input_dim] + [hidden_dim] * (num_layers - 1)
    dims_out = [hidden_dim] * (num_layers - 1) + [output_dim]

    weights, biases = [], []
    for i, (n_in, n_out) in enumerate(zip(dims_in, dims_out)):
        w, b = _init_linear_params(keys[i], n_in, n_out)
        weights.append(w)
        biases.append(b)

    x_small = jax.random.normal(keys[-2], (2, 8, input_dim), jnp.float32)
    x_big = jax.random.normal(keys[-1], (2, 300, input_dim), jnp.float32)
    y_small_ref = _mlp_reference(x_small, weights, biases)
    y_big_ref = _mlp_reference(x_big, weights, biases)

    # --- exactness check of the kernel math: f32 operand path ---------------
    w32, b32, od = prepare_mlp_params(weights, biases, compute_dtype=jnp.float32)
    y32 = jax.block_until_ready(mlp_pallas(x_small, w32, b32, od))
    assert y32.shape == (2, 8, output_dim)
    assert jnp.allclose(y32, y_small_ref, atol=1e-5, rtol=1e-5), "mismatch (f32 path)"

    # --- production path: bf16 operands, f32 accumulation -------------------
    w_t, b_2d, out_dim = prepare_mlp_params(weights, biases)  # bf16 weights

    # small primary check (batch=2, queries=8 -> M=16)
    y = jax.block_until_ready(mlp_pallas(x_small, w_t, b_2d, out_dim))
    assert y.shape == (2, 8, output_dim)
    assert jnp.allclose(y, y_small_ref, atol=5e-2, rtol=5e-2), "mismatch (bf16 small)"

    # RT-DETR-like shape: M = 2*300 = 600 (single step on v5e/v6e, 2 on v7x)
    y_big = jax.block_until_ready(mlp_pallas(x_big, w_t, b_2d, out_dim))
    assert y_big.shape == (2, 300, output_dim)
    assert jnp.allclose(y_big, y_big_ref, atol=5e-2, rtol=5e-2), "mismatch (bf16 big)"

    print("KERNEL_OK")
</pallas_src>

<mosaic_0001>
module attributes {stable_mosaic.version = 11 : i64} {
  func.func @_mlp_kernel(%arg0: i32, %arg1: memref<16x32xf32, #tpu.memory_space<vmem>>, %arg2: memref<32x32xf32, #tpu.memory_space<vmem>>, %arg3: memref<1x32xf32, #tpu.memory_space<vmem>>, %arg4: memref<32x32xf32, #tpu.memory_space<vmem>>, %arg5: memref<1x32xf32, #tpu.memory_space<vmem>>, %arg6: memref<32x128xf32, #tpu.memory_space<vmem>>, %arg7: memref<1x128xf32, #tpu.memory_space<vmem>>, %arg8: memref<16x128xf32, #tpu.memory_space<vmem>>) attributes {dimension_semantics = [#tpu.dimension_semantics<parallel>], iteration_bounds = array<i64: 1>, scalar_prefetch = 0 : i64, scratch_operands = 0 : i64, tpu.core_type = #tpu.core_type<tc>, window_params = [{transform_indices = @transform_0, window_bounds = array<i64: 16, 32>}, {pipeline_mode = #tpu.pipeline_mode<synchronous>, transform_indices = @transform_1, window_bounds = array<i64: 32, 32>}, {pipeline_mode = #tpu.pipeline_mode<synchronous>, transform_indices = @transform_2, window_bounds = array<i64: 1, 32>}, {pipeline_mode = #tpu.pipeline_mode<synchronous>, transform_indices = @transform_3, window_bounds = array<i64: 32, 32>}, {pipeline_mode = #tpu.pipeline_mode<synchronous>, transform_indices = @transform_4, window_bounds = array<i64: 1, 32>}, {pipeline_mode = #tpu.pipeline_mode<synchronous>, transform_indices = @transform_5, window_bounds = array<i64: 32, 128>}, {pipeline_mode = #tpu.pipeline_mode<synchronous>, transform_indices = @transform_6, window_bounds = array<i64: 1, 128>}, {transform_indices = @transform_7, window_bounds = array<i64: 16, 128>}]} {
    %c0 = arith.constant 0 : index
    %c0_0 = arith.constant 0 : index
    %0 = vector.load %arg1[%c0, %c0_0] : memref<16x32xf32, #tpu.memory_space<vmem>>, vector<16x32xf32>
    %c0_1 = arith.constant 0 : index
    %c0_2 = arith.constant 0 : index
    %1 = vector.load %arg2[%c0_1, %c0_2] : memref<32x32xf32, #tpu.memory_space<vmem>>, vector<32x32xf32>
    %c0_3 = arith.constant 0 : index
    %c0_4 = arith.constant 0 : index
    %2 = vector.load %arg3[%c0_3, %c0_4] : memref<1x32xf32, #tpu.memory_space<vmem>>, vector<1x32xf32>
    %cst = arith.constant dense<0.000000e+00> : vector<16x32xf32>
    %3 = tpu.matmul %0, %1, %cst {dimension_numbers = #tpu.dot_dimension_numbers<[1], [0], [0], [1], [0, 0, 1, 1], [], []>} : vector<16x32xf32>, vector<32x32xf32>, vector<16x32xf32> -> vector<16x32xf32>
    %4 = vector.broadcast %2 : vector<1x32xf32> to vector<16x32xf32>
    %5 = arith.addf %3, %4 : vector<16x32xf32>
    %cst_5 = arith.constant 0.000000e+00 : f32
    %6 = vector.broadcast %cst_5 : f32 to vector<16x32xf32>
    %7 = arith.maximumf %5, %6 : vector<16x32xf32>
    %c0_6 = arith.constant 0 : index
    %c0_7 = arith.constant 0 : index
    %8 = vector.load %arg4[%c0_6, %c0_7] : memref<32x32xf32, #tpu.memory_space<vmem>>, vector<32x32xf32>
    %c0_8 = arith.constant 0 : index
    %c0_9 = arith.constant 0 : index
    %9 = vector.load %arg5[%c0_8, %c0_9] : memref<1x32xf32, #tpu.memory_space<vmem>>, vector<1x32xf32>
    %cst_10 = arith.constant dense<0.000000e+00> : vector<16x32xf32>
    %10 = tpu.matmul %7, %8, %cst_10 {dimension_numbers = #tpu.dot_dimension_numbers<[1], [0], [0], [1], [0, 0, 1, 1], [], []>} : vector<16x32xf32>, vector<32x32xf32>, vector<16x32xf32> -> vector<16x32xf32>
    %11 = vector.broadcast %9 : vector<1x32xf32> to vector<16x32xf32>
    %12 = arith.addf %10, %11 : vector<16x32xf32>
    %cst_11 = arith.constant 0.000000e+00 : f32
    %13 = vector.broadcast %cst_11 : f32 to vector<16x32xf32>
    %14 = arith.maximumf %12, %13 : vector<16x32xf32>
    %c0_12 = arith.constant 0 : index
    %c0_13 = arith.constant 0 : index
    %15 = vector.load %arg6[%c0_12, %c0_13] : memref<32x128xf32, #tpu.memory_space<vmem>>, vector<32x128xf32>
    %c0_14 = arith.constant 0 : index
    %c0_15 = arith.constant 0 : index
    %16 = vector.load %arg7[%c0_14, %c0_15] : memref<1x128xf32, #tpu.memory_space<vmem>>, vector<1x128xf32>
    %cst_16 = arith.constant dense<0.000000e+00> : vector<16x128xf32>
    %17 = tpu.matmul %14, %15, %cst_16 {dimension_numbers = #tpu.dot_dimension_numbers<[1], [0], [0], [1], [0, 0, 1, 1], [], []>} : vector<16x32xf32>, vector<32x128xf32>, vector<16x128xf32> -> vector<16x128xf32>
    %18 = vector.broadcast %16 : vector<1x128xf32> to vector<16x128xf32>
    %19 = arith.addf %17, %18 : vector<16x128xf32>
    %c0_17 = arith.constant 0 : index
    %c0_18 = arith.constant 0 : index
    %20 = vector.load %arg8[%c0_17, %c0_18] : memref<16x128xf32, #tpu.memory_space<vmem>>, vector<16x128xf32>
    tpu.vector_store %arg8[%c0_17, %c0_18], %19 {strides = array<i32>} : memref<16x128xf32, #tpu.memory_space<vmem>>, vector<16x128xf32>,
    return
  }
  func.func @transform_0(%arg0: i32) -> (i32, i32) {
    %c0_i32 = arith.constant 0 : i32
    %c0_i32_0 = arith.constant 0 : i32
    return %arg0, %c0_i32 : i32, i32
  }
  func.func @transform_1(%arg0: i32) -> (i32, i32) {
    %c0_i32 = arith.constant 0 : i32
    %c0_i32_0 = arith.constant 0 : i32
    %c0_i32_1 = arith.constant 0 : i32
    return %c0_i32, %c0_i32_0 : i32, i32
  }
  func.func @transform_2(%arg0: i32) -> (i32, i32) {
    %c0_i32 = arith.constant 0 : i32
    %c0_i32_0 = arith.constant 0 : i32
    %c0_i32_1 = arith.constant 0 : i32
    return %c0_i32, %c0_i32_0 : i32, i32
  }
  func.func @transform_3(%arg0: i32) -> (i32, i32) {
    %c0_i32 = arith.constant 0 : i32
    %c0_i32_0 = arith.constant 0 : i32
    %c0_i32_1 = arith.constant 0 : i32
    return %c0_i32, %c0_i32_0 : i32, i32
  }
  func.func @transform_4(%arg0: i32) -> (i32, i32) {
    %c0_i32 = arith.constant 0 : i32
    %c0_i32_0 = arith.constant 0 : i32
    %c0_i32_1 = arith.constant 0 : i32
    return %c0_i32, %c0_i32_0 : i32, i32
  }
  func.func @transform_5(%arg0: i32) -> (i32, i32) {
    %c0_i32 = arith.constant 0 : i32
    %c0_i32_0 = arith.constant 0 : i32
    %c0_i32_1 = arith.constant 0 : i32
    return %c0_i32, %c0_i32_0 : i32, i32
  }
  func.func @transform_6(%arg0: i32) -> (i32, i32) {
    %c0_i32 = arith.constant 0 : i32
    %c0_i32_0 = arith.constant 0 : i32
    %c0_i32_1 = arith.constant 0 : i32
    return %c0_i32, %c0_i32_0 : i32, i32
  }
  func.func @transform_7(%arg0: i32) -> (i32, i32) {
    %c0_i32 = arith.constant 0 : i32
    %c0_i32_0 = arith.constant 0 : i32
    return %arg0, %c0_i32 : i32, i32
  }
}

</mosaic_0001>

<bundles_post_ra>
// kernel: tpu_custom_call.1
= control target key start
LH: loop header
LB: loop body
LE: loop exit
PB: predicated region body
PF: predicated region fallthrough
CT: control target
= control target key end

     0   :  { %12 = vsyncpa [#allocation3], 0  ;;  %s746_s0 = inlined_call_operand.hbm [shape: f32[16,32], index: 0, kind: input, shape index: {}]   ;;  %s747_s1 = inlined_call_operand.hbm [shape: f32[32,32], index: 1, kind: input, shape index: {}]   ;;  %s748_s2 = inlined_call_operand.vmem [shape: f32[1,32], index: 2, kind: input, shape index: {}]   ;;  %s749_s3 = inlined_call_operand.hbm [shape: f32[32,32], index: 3, kind: input, shape index: {}]   ;;  %s750_s4 = inlined_call_operand.vmem [shape: f32[1,32], index: 4, kind: input, shape index: {}]   ;;  %s751_s5 = inlined_call_operand.hbm [shape: f32[32,128], index: 5, kind: input, shape index: {}]   ;;  %s752_s6 = inlined_call_operand.vmem [shape: f32[1,128], index: 6, kind: input, shape index: {}]   ;;  %s753_s7 = inlined_call_operand.hbm [shape: f32[16,128], index: 7, kind: output, shape index: {}]  }
   0x1   :  { %13 = vsyncpa [#allocation6], 0 }
   0x2   :  { %14 = vsyncpa [#allocation9], 0 }
   0x3   :  { %15 = vsyncpa [#allocation4], 0  ;;  %s595_s24 = smov [#allocation5]   ;;  %s596_s26 = smov [#allocation2]  }
   0x4   :  { %s33_s25 = sshll.u32 %s595_s24, 4  ;;  %s21_s27 = sshll.u32 %s596_s26, 4  ;;  %s34_s25 = int_to_ptr.vmem [resolvable:$true] %s33_s25  ;;  %s642_s27 = int_to_ptr.vmem [resolvable:$true] %s21_s27 }
   0x5   :  { %s477_s30 = scalar_lea.hbm %s747_s1, 512 }
   0x6   :  { %p478_p0 = scmp.ne.s32.totalorder %s747_s1, %s477_s30  ;;  %p481_p1 = scmp.lt.u32.totalorder %s477_s30, %s747_s1 }
   0x8   :  { %p483_p2 = pnand %p481_p1, %p478_p0 }
   0xa   :  { %486 = shalt.err (!%p483_p2)
}
   0xb   :  { %s487_s12 = scalar_lea.vmem %s34_s25, 512  ;;  %p492_p4 = scmp.lt.s32.totalorder %s34_s25, %s34_s25 }
   0xc   :  { %p488_p3 = scmp.ne.s32.totalorder %s34_s25, %s487_s12  ;;  %p493_p5 = scmp.lt.s32.totalorder %s487_s12, %s487_s12 }
   0xe   :  { %p494_p6 = por %p493_p5, %p492_p4 }
  0x10   :  { %p495_p7 = pnand %p494_p6, %p488_p3 }
  0x12   :  { %498 = shalt.err (!%p495_p7)
}
  0x13   :  { %s597_s13 = smov 128   ;;  %s598_s14 = smov 8  }
  0x14   :  { %39 = dma.hbm_to_vmem [thread:$0]  %s747_s1, 512, %s34_s25, [#allocation6], %s597_s13, %s597_s13, %s598_s14  }
  0x15   :  { %s499_s19 = scalar_lea.hbm %s746_s0, 256 }
  0x16   :  { %p500_p8 = scmp.ne.s32.totalorder %s746_s0, %s499_s19  ;;  %p503_p9 = scmp.lt.u32.totalorder %s499_s19, %s746_s0 }
  0x18   :  { %p505_p10 = pnand %p503_p9, %p500_p8 }
  0x1a   :  { %508 = shalt.err (!%p505_p10)
}
  0x1b   :  { %s509_s24 = scalar_lea.vmem %s642_s27, 256  ;;  %p514_p12 = scmp.lt.s32.totalorder %s642_s27, %s642_s27 }
  0x1c   :  { %p510_p11 = scmp.ne.s32.totalorder %s642_s27, %s509_s24  ;;  %p515_p13 = scmp.lt.s32.totalorder %s509_s24, %s509_s24 }
  0x1e   :  { %p516_p0 = por %p515_p13, %p514_p12 }
  0x20   :  { %p517_p1 = pnand %p516_p0, %p510_p11 }
  0x22   :  { %520 = shalt.err (!%p517_p1)
}
  0x23   :  { %27 = dma.hbm_to_vmem [thread:$0]  %s746_s0, 256, %s642_s27, [#allocation3], %s597_s13, %s597_s13, %s598_s14  }
  0x24   :  { %s599_s26 = smov [#allocation7]   ;;  %s600_s29 = smov [#allocation8]  }
  0x25   :  { %s47_s28 = sshll.u32 %s599_s26, 4  ;;  %s61_s30 = sshll.u32 %s600_s29, 4  ;;  %s48_s28 = int_to_ptr.vmem [resolvable:$true] %s47_s28  ;;  %s679_s30 = int_to_ptr.vmem [resolvable:$true] %s61_s30 }
  0x26   :  { %s521_s10 = scalar_lea.hbm %s749_s3, 512 }
  0x27   :  { %p522_p2 = scmp.ne.s32.totalorder %s749_s3, %s521_s10  ;;  %p525_p3 = scmp.lt.u32.totalorder %s521_s10, %s749_s3 }
  0x29   :  { %p527_p4 = pnand %p525_p3, %p522_p2 }
  0x2b   :  { %530 = shalt.err (!%p527_p4)
}
  0x2c   :  { %s531_s0 = scalar_lea.vmem %s48_s28, 512  ;;  %p536_p6 = scmp.lt.s32.totalorder %s48_s28, %s48_s28 }
  0x2d   :  { %p532_p5 = scmp.ne.s32.totalorder %s48_s28, %s531_s0  ;;  %p537_p7 = scmp.lt.s32.totalorder %s531_s0, %s531_s0 }
  0x2f   :  { %p538_p8 = por %p537_p7, %p536_p6 }
  0x31   :  { %p539_p9 = pnand %p538_p8, %p532_p5 }
  0x33   :  { %542 = shalt.err (!%p539_p9)
}
  0x34   :  { %53 = dma.hbm_to_vmem [thread:$0]  %s749_s3, 512, %s48_s28, [#allocation6], %s597_s13, %s597_s13, %s598_s14  }
  0x35   :  { %s543_s20 = scalar_lea.hbm %s751_s5, 512 }
  0x36   :  { %p544_p10 = scmp.ne.s32.totalorder %s751_s5, %s543_s20  ;;  %p547_p11 = scmp.lt.u32.totalorder %s543_s20, %s751_s5 }
  0x38   :  { %p549_p12 = pnand %p547_p11, %p544_p10 }
  0x3a   :  { %552 = shalt.err (!%p549_p12)
}
  0x3b   :  { %s553_s1 = scalar_lea.vmem %s679_s30, 512  ;;  %p558_p0 = scmp.lt.s32.totalorder %s679_s30, %s679_s30 }
  0x3c   :  { %p554_p13 = scmp.ne.s32.totalorder %s679_s30, %s553_s1  ;;  %p559_p1 = scmp.lt.s32.totalorder %s553_s1, %s553_s1 }
  0x3e   :  { %p560_p2 = por %p559_p1, %p558_p0 }
  0x40   :  { %p561_p3 = pnand %p560_p2, %p554_p13 }
  0x42   :  { %564 = shalt.err (!%p561_p3)
}
  0x43   :  { %67 = dma.hbm_to_vmem [thread:$0]  %s751_s5, 512, %s679_s30, [#allocation9], %s597_s13, %s597_s13, %s598_s14  }
  0x44   :  { %587 = dma.done.wait [#allocation3], 256  }
  0x45   :  { %588 = vsyncadd [#allocation3], 4294967040 }
  0x46   :  { %589 = dma.done.wait [#allocation6], 1024  }
  0x47   :  { %590 = vsyncadd [#allocation6], 4294966272 }
  0x48   :  { %591 = dma.done.wait [#allocation9], 512  }
  0x49   :  { %592 = vsyncadd [#allocation9], 4294966784  ;;  %vm95_vm0 = vcmask 261120   ;;  %v84_v0 = vld [vmem:[#allocation5] sm:$0xff]  ;;  %v85_v1 = vld [vmem:[#allocation5 + $0x8] sm:$0xff]  ;;  %s601_s8 = smov [#allocation10]  }
  0x4a   :  { %v86_v2 = vld [vmem:[#allocation5 + $0x10] sm:$0xff]  ;;  %v446_v3 = vpack.c.bf16 %v85_v1, %v84_v0  ;;  %v87_v4 = vld [vmem:[#allocation5 + $0x18] sm:$0xff]  ;;  %v179_v7 = vld [vmem:[#allocation7] sm:$0xff]  ;;  %s372_s9 = sshll.u32 %s601_s8, 4  ;;  %s373_s9 = int_to_ptr.vmem [resolvable:$true] %s372_s9 }
  0x4b   :  { %v82_v5 = vld [vmem:[#allocation2] sm:$0xff]  ;;  %v450_v6 = vpack.c.bf16 %v87_v4, %v86_v2  ;;  %v180_v8 = vld [vmem:[#allocation7 + $0x8] sm:$0xff]  ;;  %v83_v10 = vld [vmem:[#allocation2 + $0x8] sm:$0xff]  ;;  %p570_p5 = scmp.lt.s32.totalorder %s373_s9, %s373_s9 }
  0x4c   :  { %421 = vmatprep.mubr.msk.f32.mxu0 %vm95_vm0, %v82_v5  ;;  %447 = vmatprep.subr.bf16.mxu0 %v446_v3  ;;  %v454_v9 = vpack.c.bf16 %v180_v8, %v179_v7  ;;  %v181_v11 = vld [vmem:[#allocation7 + $0x10] sm:$0xff]  ;;  %v182_v12 = vld [vmem:[#allocation7 + $0x18] sm:$0xff]  ;;  %v273_v14 = vld [vmem:[#allocation8] sm:$0xff] }
  0x4d   :  { %449 = vmatpush3.bf16.msra.mxu0 %v446_v3  ;;  %v458_v13 = vpack.c.bf16 %v182_v12, %v181_v11  ;;  %v274_v15 = vld [vmem:[#allocation8 + $0x8] sm:$0xff]  ;;  %v386_v17 = vld [vmem:[%s748_s2] ss:$0 sm:$0xff]  ;;  %v276_v25 = vld [vmem:[#allocation8 + $0x18] sm:$0xff] }
  0x4e   :  { %451 = vmatprep.subr.bf16.mxu0 %v450_v6  ;;  %455 = vmatprep.subr.bf16.mxu1 %v454_v9  ;;  %v462_v16 = vpack.c.bf16 %v274_v15, %v273_v14  ;;  %v275_v24 = vld [vmem:[#allocation8 + $0x10] sm:$0xff] }
  0x4f   :  { %457 = vmatpush3.bf16.msra.mxu1 %v454_v9  ;;  %v466_v26 = vpack.c.bf16 %v276_v25, %v275_v24  ;;  %v389_v27 = vld [vmem:[%s750_s4] ss:$0 sm:$0xff]  ;;  %s565_s4 = scalar_lea.vmem %s373_s9, 256 }
  0x50   :  { %459 = vmatprep.subr.bf16.mxu1 %v458_v13  ;;  %v392_v34 = vld [vmem:[%s752_s6] ss:$0 sm:$0xff]  ;;  %p566_p4 = scmp.ne.s32.totalorder %s373_s9, %s565_s4  ;;  %p571_p6 = scmp.lt.s32.totalorder %s565_s4, %s565_s4 }
  0x51   :  { %453 = vmatpush3.bf16.msra.mxu0 %v450_v6 }
  0x52   :  { %463 = vmatprep.subr.bf16.mxu0 %v462_v16  ;;  %p572_p7 = por %p571_p6, %p570_p5 }
  0x53   :  { %461 = vmatpush3.bf16.msra.mxu1 %v458_v13 }
  0x54   :  { %422 = vmatmul.mubr.msk.f32.vlgmr.msra.gmra.mrb[0].mxu0 %vm95_vm0, %v83_v10  ;;  %p573_p8 = pnand %p572_p7, %p566_p4 }
  0x55   :  { %465 = vmatpush3.bf16.msra.mxu0 %v462_v16 }
  0x56   :  { %467 = vmatprep.subr.bf16.mxu0 %v466_v26 }
  0x59   :  { %469 = vmatpush3.bf16.msra.mxu0 %v466_v26 }
 0x127   :  { %v423_v18 = vpop.f32.mrb[0].mxu0 }
 0x128   :  { %v174_v19 = vadd.f32 %v423_v18, %v386_v17  ;;  %v168_v20 = vpop.f32.mrb[1].mxu0 }
 0x129   :  { %v169_v21 = vadd.f32 %v386_v17, %v168_v20 }
 0x12a   :  { %v178_v23 = vmax.f32 %v174_v19, 0.0 }
 0x12b   :  { %v177_v22 = vmax.f32 %v169_v21, 0.0 }
 0x12d   :  { %432 = vmatprep.mubr.msk.f32.mxu1 %vm95_vm0, %v177_v22 }
 0x12e   :  { %433 = vmatmul.mubr.msk.f32.vlgmr.msra.gmra.mrb[0].mxu1 %vm95_vm0, %v178_v23 }
 0x201   :  { %v434_v28 = vpop.f32.mrb[0].mxu1 }
 0x202   :  { %v268_v29 = vadd.f32 %v434_v28, %v389_v27  ;;  %v262_v30 = vpop.f32.mrb[1].mxu1 }
 0x203   :  { %v263_v31 = vadd.f32 %v389_v27, %v262_v30 }
 0x204   :  { %v272_v33 = vmax.f32 %v268_v29, 0.0 }
 0x205   :  { %v271_v32 = vmax.f32 %v263_v31, 0.0 }
 0x207   :  { %443 = vmatprep.mubr.msk.f32.mxu0 %vm95_vm0, %v271_v32 }
 0x208   :  { %444 = vmatmul.mubr.msk.f32.vlgmr.msra.gmra.mrb[2].mxu0 %vm95_vm0, %v272_v33 }
 0x2db   :  { %v445_v35 = vpop.f32.mrb[2].mxu0 }
 0x2dc   :  { %v362_v36 = vadd.f32 %v445_v35, %v392_v34  ;;  %v356_v37 = vpop.f32.mrb[3].mxu0 }
 0x2dd   :  { %v357_v38 = vadd.f32 %v392_v34, %v356_v37 }
 0x2de   :  { %366 = vst [vmem:[#allocation10 + $0x8] sm:$0xff] %v362_v36 }
 0x2df   :  { %365 = vst [vmem:[#allocation10] sm:$0xff] %v357_v38 }
 0x2e0   :  { %576 = shalt.err (!%p573_p8)
}
 0x2e1   :  { %s577_s6 = scalar_lea.hbm %s753_s7, 256 }
 0x2e2   :  { %p578_p9 = scmp.ne.s32.totalorder %s753_s7, %s577_s6  ;;  %p581_p10 = scmp.lt.u32.totalorder %s577_s6, %s753_s7 }
 0x2e4   :  { %p583_p11 = pnand %p581_p10, %p578_p9 }
 0x2e6   :  { %586 = shalt.err (!%p583_p11)
}
 0x2e7   :  { %378 = dma.vmem_to_hbm [thread:$0]  %s373_s9, 256, %s753_s7, [#allocation4], %s597_s13, %s597_s13, %s598_s14  }
 0x2e8   :  { %593 = dma.done.wait [#allocation4], 256  }
 0x2e9   :  { %594 = vsyncadd [#allocation4], 4294967040 }
 0x2ea   :  { %382 = vsyncpa [#allocation3], 1 }
 0x2eb   :  { %383 = vsyncpa [#allocation6], 1 }
 0x2ec   :  { %384 = vsyncpa [#allocation9], 1 }
 0x2ed   :  { %385 = vsyncpa [#allocation4], 1 }

</bundles_post_ra>
